<compile_context>
chip_gen: v6e
topology: v6e:2x2x1
jax: 0.10.0
libtpu: 0.0.40
codegen_flags: <defaults>
</compile_context>

<pallas_src>
import functools

import jax
import jax.numpy as jnp
from jax import lax
from jax.experimental import pallas as pl
from jax.experimental.pallas import tpu as pltpu


def _rope_kernel(x_ref, cos_ref, sin_ref, o_ref, *, d2: int, head_dim: int):
    """One (tS, H*D) tile: out = x*cos + rotate_half(x)*sin, one full-width store.

    x_ref / o_ref     : (tS, H*D)   (leading size-1 batch dim squeezed away)
    cos_ref / sin_ref : (tS, H*D)   head-tiled, sign-folded, pass-through padded
    """
    x = x_ref[...]
    hd = x.shape[-1]

    # rotate_half within each head via two full-lane XLU rolls + a lane-position
    # select.  (A single roll would wrap across head boundaries and, for d < D,
    # into the pass-through channels.)
    roll_fwd = pltpu.roll(x, d2, 1)        # lane i <- x[i - d2]
    roll_bwd = pltpu.roll(x, hd - d2, 1)   # lane i <- x[i + d2]
    lane = lax.broadcasted_iota(jnp.int32, x.shape, 1)
    rotated = jnp.where((lane % head_dim) < d2, roll_bwd, roll_fwd)

    # cos == 1 and sin == 0 in pass-through lanes; sin's first half carries the
    # minus sign -> a single fused multiply-add and one lane-dense store.
    o_ref[...] = (x * cos_ref[...] + rotated * sin_ref[...]).astype(o_ref.dtype)


def _build_folded_cache(seq_len: int, D: int, d: int, base: int):
    """Full-width (S, D) cos / sign-folded sin caches, float32.

    cos[:, :d2] = cos[:, d2:d] = cos(idx_theta); cos[:, d:] = 1
    sin[:, :d2] = -sin(idx_theta); sin[:, d2:d] = +sin(idx_theta); sin[:, d:] = 0
    """
    d2 = d // 2
    seq_idx = jnp.arange(seq_len, dtype=jnp.float32)
    k = jnp.arange(0, d, 2, dtype=jnp.float32)
    # Faithful to the LabML/PyTorch precedence quirk: theta = 1 / (base**k / d)
    theta = 1.0 / (jnp.float32(base) ** k / jnp.float32(d))
    idx_theta = seq_idx[:, None] * theta[None, :]              # (S, d/2)
    cos_h = jnp.cos(idx_theta)
    sin_h = jnp.sin(idx_theta)
    pass_w = D - d
    cos_full = jnp.concatenate(
        [cos_h, cos_h, jnp.ones((seq_len, pass_w), jnp.float32)], axis=-1)
    sin_full = jnp.concatenate(
        [-sin_h, sin_h, jnp.zeros((seq_len, pass_w), jnp.float32)], axis=-1)
    return cos_full, sin_full


def _vmem_limit_bytes() -> int:
    """Scoped VMEM limit derived from the actual chip (v7x: 64 MiB, v5e/v6e: 128 MiB)."""
    try:
        cap = int(pltpu.get_tpu_info().vmem_capacity_bytes)
    except Exception:  # unknown chip / interpret mode — conservative default
        cap = 64 * 1024 * 1024
    return max(16 * 1024 * 1024, min(cap // 2, 96 * 1024 * 1024))


def _choose_seq_tile(S: int, row_bytes: int, vmem_limit: int) -> int:
    """Largest sequence tile (multiple of 8, or full S) whose double-buffered
    x+out+cos+sin tiles fit in ~3/4 of the scoped VMEM limit."""
    budget = (3 * vmem_limit) // 4          # headroom for Mosaic scratch
    cap = budget // max(2 * row_bytes, 1)   # x2: double-buffered pipeline
    if cap >= S:
        return S
    return max(8, (cap // 8) * 8)


def rotary_embedding_labml(x: jax.Array, d: int, base: int = 10000) -> jax.Array:
    """x: (B, S, H, D); rotary applied to the first `d` channels of D."""
    B, S, H, D = x.shape
    assert d % 2 == 0 and 0 < d <= D, "d must be even and <= head_dim"
    d2 = d // 2
    HD = H * D

    # Full-width, sign-folded caches, tiled per head along the lane axis.
    cos_full, sin_full = _build_folded_cache(S, D, d, base)      # (S, D) f32
    cos_full = jnp.tile(cos_full, (1, H))                        # (S, H*D)
    sin_full = jnp.tile(sin_full, (1, H))
    if x.dtype != jnp.float32:
        cos_full = cos_full.astype(x.dtype)
        sin_full = sin_full.astype(x.dtype)

    # Fold heads into the lane axis: (B, S, H*D) — lane-dense, no sublane padding.
    x_folded = x.reshape(B, S, HD)

    vmem_limit = _vmem_limit_bytes()
    row_bytes = HD * (2 * x.dtype.itemsize + 2 * cos_full.dtype.itemsize)
    tS = _choose_seq_tile(S, row_bytes, vmem_limit)
    grid = (pl.cdiv(S, tS), B)   # B innermost: cos/sin tiles stay VMEM-resident

    kernel = functools.partial(_rope_kernel, d2=d2, head_dim=D)

    out = pl.pallas_call(
        kernel,
        out_shape=jax.ShapeDtypeStruct((B, S, HD), x.dtype),
        grid_spec=pltpu.PrefetchScalarGridSpec(
            num_scalar_prefetch=0,
            grid=grid,
            in_specs=[
                # Leading batch dim squeezed (block size 1, not seen in kernel).
                pl.BlockSpec((None, tS, HD), lambda s, b: (b, s, 0)),
                pl.BlockSpec((tS, HD), lambda s, b: (s, 0)),
                pl.BlockSpec((tS, HD), lambda s, b: (s, 0)),
            ],
            out_specs=pl.BlockSpec((None, tS, HD), lambda s, b: (b, s, 0)),
        ),
        compiler_params=pltpu.CompilerParams(
            dimension_semantics=("parallel", "parallel"),
            vmem_limit_bytes=vmem_limit,
        ),
    )(x_folded, cos_full, sin_full)

    return out.reshape(B, S, H, D)


def _reference(x: jax.Array, d: int, base: int = 10000) -> jax.Array:
    """Pure-JAX transcription of the PyTorch forward (independent of the kernel's
    sign-folded/rolled formulation), for verification."""
    B, S, H, D = x.shape
    d2 = d // 2
    seq_idx = jnp.arange(S, dtype=jnp.float32)
    k = jnp.arange(0, d, 2, dtype=jnp.float32)
    theta = 1.0 / (jnp.float32(base) ** k / jnp.float32(d))
    idx_theta = seq_idx[:, None] * theta[None, :]
    idx_theta2 = jnp.concatenate([idx_theta, idx_theta], axis=-1)
    cos = jnp.cos(idx_theta2)[None, :, None, :]
    sin = jnp.sin(idx_theta2)[None, :, None, :]
    x_rope, x_pass = x[..., :d], x[..., d:]
    neg = jnp.concatenate([-x_rope[..., d2:], x_rope[..., :d2]], axis=-1)
    out = x_rope * cos + neg * sin
    return jnp.concatenate([out, x_pass], axis=-1)


if __name__ == "__main__":
    # Small shapes consistent with the module: (batch, seq, heads, head_dim)
    B, S, H, D = 2, 8, 4, 32

    key = jax.random.PRNGKey(0)
    x = jax.random.normal(key, (B, S, H, D), dtype=jnp.float32)

    # Partial rotation (d < D) — exercises the pass-through lanes.
    d_rot = 16
    out = jax.block_until_ready(rotary_embedding_labml(x, d_rot))
    ref = _reference(x, d_rot)
    assert out.shape == x.shape
    assert jnp.allclose(out, ref, atol=1e-5, rtol=1e-5), "mismatch vs reference (d < D)"

    # Full rotation (d == D).
    out_full = jax.block_until_ready(rotary_embedding_labml(x, D))
    ref_full = _reference(x, D)
    assert jnp.allclose(out_full, ref_full, atol=1e-5, rtol=1e-5), "mismatch vs reference (d == D)"

    print("KERNEL_OK")
</pallas_src>

<mosaic_0001>
module attributes {stable_mosaic.version = 11 : i64} {
  func.func @_rope_kernel(%arg0: i32, %arg1: i32, %arg2: memref<1x8x128xf32, #tpu.memory_space<vmem>>, %arg3: memref<8x128xf32, #tpu.memory_space<vmem>>, %arg4: memref<8x128xf32, #tpu.memory_space<vmem>>, %arg5: memref<1x8x128xf32, #tpu.memory_space<vmem>>) attributes {dimension_semantics = [#tpu.dimension_semantics<parallel>, #tpu.dimension_semantics<parallel>], iteration_bounds = array<i64: 1, 2>, scalar_prefetch = 0 : i64, scratch_operands = 0 : i64, tpu.core_type = #tpu.core_type<tc>, window_params = [{transform_indices = @transform_0, window_bounds = array<i64: 1, 8, 128>}, {transform_indices = @transform_1, window_bounds = array<i64: 8, 128>}, {transform_indices = @transform_2, window_bounds = array<i64: 8, 128>}, {transform_indices = @transform_3, window_bounds = array<i64: 1, 8, 128>}]} {
    %c0 = arith.constant 0 : index
    %c0_0 = arith.constant 0 : index
    %c0_1 = arith.constant 0 : index
    %0 = vector.load %arg2[%c0, %c0_0, %c0_1] : memref<1x8x128xf32, #tpu.memory_space<vmem>>, vector<1x8x128xf32>
    %1 = vector.shape_cast %0 : vector<1x8x128xf32> to vector<8x128xf32>
    %c8_i32 = arith.constant 8 : i32
    %2 = tpu.dynamic_rotate %1 by %c8_i32 dim 1 : vector<8x128xf32>, i32 -> vector<8x128xf32>
    %c120_i32 = arith.constant 120 : i32
    %3 = tpu.dynamic_rotate %1 by %c120_i32 dim 1 : vector<8x128xf32>, i32 -> vector<8x128xf32>
    %4 = tpu.iota {dimensions = array<i32: 1>} : vector<8x128xi32>
    %c32_i32 = arith.constant 32 : i32
    %c0_i32 = arith.constant 0 : i32
    %5 = arith.cmpi eq, %c32_i32, %c0_i32 : i32
    %c1_i32 = arith.constant 1 : i32
    %6 = arith.select %5, %c1_i32, %c32_i32 : i32
    %7 = vector.broadcast %6 : i32 to vector<8x128xi32>
    %8 = arith.remsi %4, %7 : vector<8x128xi32>
    %c0_i32_2 = arith.constant 0 : i32
    %9 = vector.broadcast %c0_i32_2 : i32 to vector<8x128xi32>
    %10 = arith.cmpi ne, %8, %9 : vector<8x128xi32>
    %c0_i32_3 = arith.constant 0 : i32
    %11 = vector.broadcast %c0_i32_3 : i32 to vector<8x128xi32>
    %12 = arith.cmpi slt, %8, %11 : vector<8x128xi32>
    %c0_i32_4 = arith.constant 0 : i32
    %13 = arith.cmpi slt, %6, %c0_i32_4 : i32
    %14 = vector.broadcast %13 : i1 to vector<8x128xi1>
    %15 = vector.broadcast %14 : vector<8x128xi1> to vector<8x128xi1>
    %16 = arith.xori %12, %15 : vector<8x128xi1>
    %17 = arith.andi %16, %10 : vector<8x128xi1>
    %18 = vector.broadcast %6 : i32 to vector<8x128xi32>
    %19 = arith.addi %8, %18 : vector<8x128xi32>
    %20 = arith.select %17, %19, %8 : vector<8x128xi1>, vector<8x128xi32>
    %c8_i32_5 = arith.constant 8 : i32
    %21 = vector.broadcast %c8_i32_5 : i32 to vector<8x128xi32>
    %22 = arith.cmpi slt, %20, %21 : vector<8x128xi32>
    %23 = arith.select %22, %3, %2 : vector<8x128xi1>, vector<8x128xf32>
    %c0_6 = arith.constant 0 : index
    %c0_7 = arith.constant 0 : index
    %24 = vector.load %arg3[%c0_6, %c0_7] : memref<8x128xf32, #tpu.memory_space<vmem>>, vector<8x128xf32>
    %25 = arith.mulf %1, %24 : vector<8x128xf32>
    %c0_8 = arith.constant 0 : index
    %c0_9 = arith.constant 0 : index
    %26 = vector.load %arg4[%c0_8, %c0_9] : memref<8x128xf32, #tpu.memory_space<vmem>>, vector<8x128xf32>
    %27 = arith.mulf %23, %26 : vector<8x128xf32>
    %28 = arith.addf %25, %27 : vector<8x128xf32>
    %c0_10 = arith.constant 0 : index
    %c0_11 = arith.constant 0 : index
    %c0_12 = arith.constant 0 : index
    %29 = vector.load %arg5[%c0_10, %c0_11, %c0_12] : memref<1x8x128xf32, #tpu.memory_space<vmem>>, vector<1x8x128xf32>
    %30 = vector.shape_cast %29 : vector<1x8x128xf32> to vector<8x128xf32>
    %31 = vector.shape_cast %28 : vector<8x128xf32> to vector<1x8x128xf32>
    tpu.vector_store %arg5[%c0_10, %c0_11, %c0_12], %31 {strides = array<i32>} : memref<1x8x128xf32, #tpu.memory_space<vmem>>, vector<1x8x128xf32>,
    return
  }
  func.func @transform_0(%arg0: i32, %arg1: i32) -> (i32, i32, i32) {
    %c0_i32 = arith.constant 0 : i32
    %c0_i32_0 = arith.constant 0 : i32
    return %arg1, %arg0, %c0_i32 : i32, i32, i32
  }
  func.func @transform_1(%arg0: i32, %arg1: i32) -> (i32, i32) {
    %c0_i32 = arith.constant 0 : i32
    %c0_i32_0 = arith.constant 0 : i32
    return %arg0, %c0_i32 : i32, i32
  }
  func.func @transform_2(%arg0: i32, %arg1: i32) -> (i32, i32) {
    %c0_i32 = arith.constant 0 : i32
    %c0_i32_0 = arith.constant 0 : i32
    return %arg0, %c0_i32 : i32, i32
  }
  func.func @transform_3(%arg0: i32, %arg1: i32) -> (i32, i32, i32) {
    %c0_i32 = arith.constant 0 : i32
    %c0_i32_0 = arith.constant 0 : i32
    return %arg1, %arg0, %c0_i32 : i32, i32, i32
  }
}

</mosaic_0001>

<bundles_post_ra>
// kernel: tpu_custom_call.1
= control target key start
LH: loop header
LB: loop body
LE: loop exit
PB: predicated region body
PF: predicated region fallthrough
CT: control target
= control target key end

     0   :  { %8 = vsyncpa [#allocation3], 0  ;;  %s855_s0 = inlined_call_operand.hbm [shape: f32[2,8,128], index: 0, kind: input, shape index: {}]   ;;  %s856_s1 = inlined_call_operand.hbm [shape: f32[8,128], index: 1, kind: input, shape index: {}]   ;;  %s857_s2 = inlined_call_operand.hbm [shape: f32[8,128], index: 2, kind: input, shape index: {}]   ;;  %s858_s3 = inlined_call_operand.hbm [shape: f32[2,8,128], index: 3, kind: output, shape index: {}]  }
   0x1   :  { %10 = vsyncpa [#allocation3 + $0x1], 0 }
   0x2   :  { %11 = vsyncpa [#allocation6], 0 }
   0x3   :  { %12 = vsyncpa [#allocation4], 0 }
   0x4   :  { %14 = vsyncpa [#allocation4 + $0x1], 0  ;;  %s681_s12 = smov 0   ;;  %s683_s13 = smov 0  }
   0x5   :  { %s685_s14 = smov 0   ;;  %s687_s15 = smov 0  }
   0x6   :  { %s689_s16 = smov 0   ;;  %s691_s17 = smov 0  }
   0x7 LB: > { %s387_s18 = sadd.s32 4294967295, %s653_s17   ;;  %s388_s19 = sadd.s32 4294967294, %s653_s17   ;;  %s653_s17 = sphi %s691_s17, %s20_s17   ;;  %s649_s16 = sphi %s689_s16, %s881_s16   ;;  %s645_s15 = sphi %s687_s15, %s880_s15   ;;  %s641_s14 = sphi %s685_s14, %s879_s14   ;;  %s637_s13 = sphi %s683_s13, %s878_s13   ;;  %s633_s12 = sphi %s681_s12, %s877_s12  }
   0x8   : > { %p54_p0 = scmp.ne.s32.totalorder %s637_s13, %s633_s12  ;;  %p715_p1 = scmp.eq.s32.totalorder %s387_s18, 0 }
   0x9   : > { %p719_p2 = scmp.eq.s32.totalorder %s387_s18, 1  ;;  %p138_p3 = scmp.eq.s32.totalorder %s388_s19, 1 }
   0xa   : > { %s863_s20 = scalar_select %p715_p1, 1, 0 }
   0xb   : > { %s864_s21 = scalar_select %p719_p2, 1, 0 }
   0xc   : > { %p725_p4 = por %p715_p1, %p54_p0  ;;  %p389_p5 = scmp.ge.s32.totalorder %s653_s17, 1 }
   0xd   : > { %p730_p6 = por %p138_p3, %p54_p0  ;;  %p145_p7 = scmp.lt.s32.totalorder %s653_s17, 3 }
   0xe   : > { %s865_s22 = scalar_select %p725_p4, 1, 0 }
   0xf   : > { %s866_s23 = scalar_select %p730_p6, 1, 0 }
  0x10   : > { %p735_p8 = pnand %p389_p5, %p145_p7  ;;  %s655_s25 = smov [#allocation5]  }
  0x11   : > { %s160_s26 = sshll.u32 %s655_s25, 4  ;;  %s656_s27 = smov [#allocation7]   ;;  %s161_s26 = int_to_ptr.vmem [resolvable:$true] %s160_s26 }
  0x12   : > { %s867_s24 = scalar_select %p735_p8, 1, 0 }
  0x13   : > { %p416_p10 = pneg %p735_p8  ;;  %s173_s28 = sshll.u32 %s656_s27, 4  ;;  %s174_s28 = int_to_ptr.vmem [resolvable:$true] %s173_s28 }
  0x14   : > { %s500_s30 = scalar_lea.vmem %s161_s26, 128  ;;  %p508_p5 = scmp.lt.s32.totalorder %s161_s26, %s161_s26 }
  0x15   : > { %p744_p11 = pnand %p416_p10, %p715_p1  ;;  %p501_p13 = scmp.ne.s32.totalorder %s161_s26, %s500_s30 }
  0x16   : > { %p509_p7 = scmp.lt.s32.totalorder %s500_s30, %s500_s30 }
  0x17   : > { %p491_p12 = pneg %p744_p11 }
  0x18   : > { %p510_p9 = por %p509_p7, %p508_p5 }
  0x19   : > { %p503_p0 = pnand %p501_p13, %p491_p12 }
  0x1b   : > { %p504_p3 = pneg %p503_p0 }
  0x1d   : > { %p511_p6 = pnand %p510_p9, %p504_p3 }
  0x1f   : > { %514 = shalt.err (!%p511_p6)
}
  0x20   : > { %419 = dma.hbm_to_vmem [thread:$0]  (!%p744_p11), %s856_s1, 128, %s161_s26, [#allocation6]  }
  0x21   : > { %s526_s6 = scalar_lea.vmem %s174_s28, 128  ;;  %p534_p13 = scmp.lt.s32.totalorder %s174_s28, %s174_s28 }
  0x22   : > { %p527_p10 = scmp.ne.s32.totalorder %s174_s28, %s526_s6  ;;  %p535_p0 = scmp.lt.s32.totalorder %s526_s6, %s526_s6 }
  0x24   : > { %p529_p1 = pnand %p527_p10, %p491_p12  ;;  %p536_p8 = por %p535_p0, %p534_p13 }
  0x26   : > { %p530_p4 = pneg %p529_p1 }
  0x28   : > { %p537_p2 = pnand %p536_p8, %p530_p4 }
  0x2a   : > { %540 = shalt.err (!%p537_p2)
}
  0x2b   : > { %422 = dma.hbm_to_vmem [thread:$0]  (!%p744_p11), %s857_s2, 128, %s174_s28, [#allocation6]  }
  0x2c   : > { %s29_s9 = sadd.s32 1, %s649_s16  ;;  %s41_s10 = sadd.s32 1, %s641_s14 }
  0x2d   : > { %p30_p1 = scmp.ge.s32.totalorder %s29_s9, 2  ;;  %p48_p2 = scmp.ne.s32.totalorder %s641_s14, %s637_s13 }
  0x2e   : > { %p49_p4 = scmp.eq.s32.totalorder %s653_s17, 0  ;;  %p433_p6 = scmp.lt.s32.totalorder %s653_s17, 2 }
  0x2f   : > { %s883_s9 = smov (%p30_p1, %s29_s9), 0  ;;  %p869_p9 = scmp.ne.s32.totalorder %s864_s21, 0 }
  0x30   : > { %p50_p8 = por %p49_p4, %p48_p2  ;;  %s36_s18 = ssub.s32 %s649_s16, %s883_s9 }
  0x31   : > { %p776_p12 = por %p869_p9, %p48_p2  ;;  %s184_s19 = sand.u32 1, %s641_s14  }
  0x32   : > { %p39_p3 = scmp.eq.s32.totalorder %s36_s18, 0  ;;  %s393_s25 = sshll.u32 %s184_s19, 3 }
  0x33   : > { %s394_s26 = sshll.u32 %s649_s16, 7  ;;  %s188_s4 = scalar_lea.vmem [#allocation2], %s393_s25 }
  0x34   : > { %s785_s27 = scalar_select %p39_p3, %s641_s14, %s41_s10  }
  0x35   : > { %s194_s30 = scalar_lea.hbm %s855_s0, %s394_s26  ;;  %s196_s5 = sshll.u32 %s188_s4, 4  ;;  %s197_s5 = int_to_ptr.vmem [resolvable:$true] %s196_s5 }
  0x36   : > { %p792_p11 = pnand %p433_p6, %p50_p8  ;;  %s185_s6 = scalar_lea.sflag [#allocation3], %s184_s19 }
  0x37   : > { %s554_s7 = scalar_lea.vmem %s197_s5, 128  ;;  %s657_s8 = smov [#allocation2]  }
  0x38   : > { %p543_p5 = pneg %p792_p11  ;;  %p555_p7 = scmp.ne.s32.totalorder %s197_s5, %s554_s7 }
  0x39   : > { %s559_s10 = sshll.u32 %s657_s8, 4  ;;  %s560_s10 = int_to_ptr.vmem [resolvable:$false] %s559_s10 }
  0x3a   : > { %p557_p10 = pnand %p555_p7, %p543_p5  ;;  %s561_s18 = scalar_lea.vmem %s560_s10, 256 }
  0x3b   : > { %p562_p0 = scmp.lt.s32.totalorder %s197_s5, %s560_s10  ;;  %p563_p1 = scmp.lt.s32.totalorder %s561_s18, %s554_s7 }
  0x3c   : > { %p558_p13 = pneg %p557_p10 }
  0x3d   : > { %p564_p2 = por %p563_p1, %p562_p0 }
  0x3f   : > { %p565_p4 = pnand %p564_p2, %p558_p13 }
  0x41   : > { %568 = shalt.err (!%p565_p4)
}
  0x42   : > { %426 = dma.hbm_to_vmem [thread:$0]  (!%p792_p11), %s194_s30, 128, %s197_s5, %s185_s6  }
  0x43   : > { %p872_p6 = scmp.ne.s32.totalorder %s867_s24, 0 }
  0x44   : > { %s803_s19 = sand.u32 (!%p872_p6), 1, %s637_s13   ;;  %p873_p8 = scmp.ne.s32.totalorder (!%p872_p6), %s865_s22, 0 }
  0x45   : > { %205 = sbr.rel (%p872_p6) target bundleno = 216 (0xd8), region = 32  ;;  %s396_s25 = sshll.u32 (!%p872_p6), %s803_s19, 3 }
  0x46   : > { %s208_s26 = scalar_lea.sflag (!%p872_p6), [#allocation3], %s803_s19  ;;  %s211_s28 = scalar_lea.vmem (!%p872_p6), [#allocation2], %s396_s25 }
  0x4a   : > { %620 = dma.done.wait (%p873_p8), %s208_s26, 128  }
  0x4b   : > { %622 = vsyncadd (%p873_p8), %s208_s26, 4294967168  ;;  %p874_p9 = scmp.ne.s32.totalorder %s863_s20, 0 }
  0x4d   : > { %624 = dma.done.wait (%p874_p9), [#allocation6], 256  }
  0x4e   : > { %626 = vsyncadd (%p874_p9), [#allocation6], 4294967040  ;;  %v242_v0 = vld [vmem:[%s211_s28] sm:$0xff]  ;;  %s658_s24 = smov 8   ;;  %s659_s29 = smov 120   ;;  %v247_v1 = vlaneseq  ;;  %v263_v5 = vld [vmem:[#allocation5] sm:$0xff] }
  0x4f   : > { %243 = vrot.lane.b32.xlu0 %v242_v0, %s658_s24  ;;  %v265_v6 = vld [vmem:[#allocation7] sm:$0xff]  ;;  %v264_v7 = vmul.f32 %v263_v5, %v242_v0  ;;  %s401_s20 = sshll.u32 %s645_s15, 7  ;;  %s241_s22 = scalar_lea.vmem [#allocation8], %s396_s25 }
  0x50   : > { %v248_v2 = vand.u32 127, %v247_v1  ;;  %s284_s30 = sshll.u32 %s241_s22, 4  ;;  %s282_s21 = scalar_lea.hbm %s858_s3, %s401_s20  ;;  %s285_s30 = int_to_ptr.vmem [resolvable:$true] %s284_s30 }
  0x51   : > { %s270_s6 = scalar_lea.sflag [#allocation4], %s803_s19  ;;  %s569_s7 = scalar_lea.vmem %s285_s30, 128 }
  0x52   : > { %v253_v3 = vand.u32 31, %v248_v2  ;;  %p570_p3 = scmp.ne.s32.totalorder %s285_s30, %s569_s7  ;;  %s660_s8 = smov [#allocation8]  }
  0x53   : > { %245 = vrot.lane.b32.xlu0 %v242_v0, %s659_s29  ;;  %s573_s10 = sshll.u32 %s660_s8, 4  ;;  %s574_s10 = int_to_ptr.vmem [resolvable:$false] %s573_s10 }
  0x54   : > { %vm261_vm0 = vcmp.lt.s32.totalorder %v253_v3, 8  ;;  %p571_p11 = pnand %p570_p3, %p776_p12  ;;  %s575_s15 = scalar_lea.vmem %s574_s10, 256 }
  0x55   : > { %p576_p7 = scmp.lt.s32.totalorder %s285_s30, %s574_s10  ;;  %p577_p10 = scmp.lt.s32.totalorder %s575_s15, %s569_s7 }
  0x56   : > { %p572_p5 = pneg %p571_p11 }
  0x57   : > { %p578_p13 = por %p577_p10, %p576_p7 }
  0x59   : > { %p579_p0 = pnand %p578_p13, %p572_p5 }
  0xc1   : > { %v244_v4 = vpop.permute.xlu0 %243 }
  0xc5   : > { %v246_v8 = vpop.permute.xlu0 %245 }
  0xc6   : > { %v262_v9 = vsel %vm261_vm0, %v246_v8, %v244_v4 }
  0xc7   : > { %v266_v10 = vmul.f32 %v265_v6, %v262_v9 }
  0xc9   : > { %v267_v11 = vadd.f32 %v266_v10, %v264_v7 }
  0xcb   : > { %268 = vst [vmem:[%s241_s22] sm:$0xff] %v267_v11 }
  0xcc   : > { %582 = shalt.err (!%p579_p0)
}
  0xcd   : > { %s583_s18 = scalar_lea.hbm %s282_s21, 128  ;;  %s587_s26 = scalar_lea.hbm %s858_s3, 256 }
  0xce   : > { %p584_p1 = scmp.ne.s32.totalorder %s282_s21, %s583_s18  ;;  %p588_p6 = scmp.lt.s32.totalorder %s282_s21, %s858_s3 }
  0xcf   : > { %p589_p8 = scmp.lt.s32.totalorder %s587_s26, %s583_s18 }
  0xd0   : > { %p585_p2 = pnand %p584_p1, %p776_p12 }
  0xd1   : > { %p590_p9 = por %p589_p8, %p588_p6 }
  0xd2   : > { %p586_p4 = pneg %p585_p2 }
  0xd4   : > { %p591_p3 = pnand %p590_p9, %p586_p4 }
  0xd6   : > { %594 = shalt.err (!%p591_p3)
}
  0xd7   : > { %414 = dma.vmem_to_hbm [thread:$0]  (%p776_p12), %s285_s30, 128, %s282_s21, %s270_s6  }
  0xd8 PF: > { %s296_s29 = sand.u32 1, %s633_s12   ;;  %p875_p11 = scmp.ne.s32.totalorder %s866_s23, 0 }
  0xd9   : > { %p876_p5 = scmp.ge.s32.totalorder %s653_s17, 2  ;;  %s297_s20 = scalar_lea.sflag [#allocation4], %s296_s29 }
  0xdb   : > { %p428_p7 = pnand %p876_p5, %p875_p11 }
  0xdd   : > { %p429_p10 = pneg %p428_p7 }
  0xdf   : > { %628 = dma.done.wait (%p429_p10), %s297_s20, 128  }
  0xe0   : > { %630 = vsyncadd (%p429_p10), %s297_s20, 4294967168  ;;  %s20_s17 = sadd.s32 1, %s653_s17   ;;  %s877_s12 = smov %s637_s13 }
  0xe1   : > { %p17_p13 = scmp.ge.s32.totalorder %s20_s17, 4   ;;  %s878_s13 = smov %s641_s14 }
  0xe2   : > { %s879_s14 = smov %s785_s27  ;;  %s880_s15 = smov %s649_s16 }
  0xe3   : > { %s881_s16 = smov %s883_s9  ;;  %19 = sbr.rel (!%p17_p13) target bundleno = 7 (0x7), region = 87 }
  0xe8   :  { %302 = vsyncpa [#allocation3], 1 }
  0xe9   :  { %304 = vsyncpa [#allocation3 + $0x1], 1 }
  0xea   :  { %305 = vsyncpa [#allocation6], 1 }
  0xeb   :  { %306 = vsyncpa [#allocation4], 1 }
  0xec   :  { %308 = vsyncpa [#allocation4 + $0x1], 1 }

</bundles_post_ra>
